<compile_context>
chip_gen: v5e
topology: v5e:2x2
jax: 0.10.0
libtpu: 0.0.40
codegen_flags: <defaults>
</compile_context>

<pallas_src>
import functools

import jax
import jax.numpy as jnp
import numpy as np
from jax.experimental import pallas as pl
from jax.experimental.pallas import tpu as pltpu


# ----------------------------------------------------------------------------
# Single-pair kernels: ratio = exp(w[i] - w[j])
# ----------------------------------------------------------------------------
def _kd_ratio_static_kernel(i, j, w_ref, o_ref):
    # w_ref: SMEM (K,) f32   o_ref: VMEM (1, 1) f32   i, j: compile-time ints
    d = w_ref[i] - w_ref[j]                      # two sld, one scalar sub
    o_ref[...] = jnp.exp(jnp.full((1, 1), d, jnp.float32))


def _kd_ratio_dynamic_kernel(ij_ref, w_ref, o_ref):
    # ij_ref: SMEM (2,) int32   w_ref: SMEM (K,) f32   o_ref: VMEM (1, 1) f32
    d = w_ref[ij_ref[0]] - w_ref[ij_ref[1]]      # scalar-path gather from SMEM
    o_ref[...] = jnp.exp(jnp.full((1, 1), d, jnp.float32))


# ----------------------------------------------------------------------------
# Batched kernel: many (i, j) pairs per call, lane-dense in/out.
# ----------------------------------------------------------------------------
def _kd_ratio_batched_kernel(w_ref, i_ref, j_ref, o_ref):
    # w_ref: SMEM (K,) f32
    # i_ref, j_ref: VMEM (1, tile_n) int32   o_ref: VMEM (1, tile_n) f32
    K = w_ref.shape[0]
    ii = i_ref[...]
    jj = j_ref[...]
    wi = jnp.zeros(ii.shape, jnp.float32)
    wj = jnp.zeros(jj.shape, jnp.float32)
    # K is small and static: unrolled select-based gather, fully lane-parallel,
    # no cross-lane (XLU) traffic and no MXU one-hot matmul.
    for k in range(K):
        wk = w_ref[k]
        wi = jnp.where(ii == k, wk, wi)
        wj = jnp.where(jj == k, wk, wj)
    o_ref[...] = jnp.exp(wi - wj)


# ----------------------------------------------------------------------------
# Wrappers
# ----------------------------------------------------------------------------
def kd_weights_forward(kd_weights, i, j):
    """softmax(kd_weights)[i] / softmax(kd_weights)[j]  (== exp(w[i]-w[j]))."""
    w = jnp.asarray(kd_weights, jnp.float32).reshape(-1)   # (K,) in SMEM

    static_ij = isinstance(i, (int, np.integer)) and isinstance(j, (int, np.integer))
    if static_ij:
        kernel = functools.partial(_kd_ratio_static_kernel, int(i), int(j))
        out = pl.pallas_call(
            kernel,
            out_shape=jax.ShapeDtypeStruct((1, 1), jnp.float32),
            in_specs=[pl.BlockSpec(memory_space=pltpu.MemorySpace.SMEM)],
            out_specs=pl.BlockSpec(memory_space=pltpu.MemorySpace.VMEM),
        )(w)
    else:
        ij = jnp.stack(
            [jnp.asarray(i, jnp.int32).reshape(()), jnp.asarray(j, jnp.int32).reshape(())]
        )
        out = pl.pallas_call(
            _kd_ratio_dynamic_kernel,
            out_shape=jax.ShapeDtypeStruct((1, 1), jnp.float32),
            in_specs=[
                pl.BlockSpec(memory_space=pltpu.MemorySpace.SMEM),   # (i, j)
                pl.BlockSpec(memory_space=pltpu.MemorySpace.SMEM),   # weights
            ],
            out_specs=pl.BlockSpec(memory_space=pltpu.MemorySpace.VMEM),
        )(ij, w)
    return out[0, 0]


def kd_weights_forward_batched(kd_weights, i_idx, j_idx, *, tile_n=128):
    """Vectorized forward over N (i, j) pairs; amortizes the per-call overhead."""
    w = jnp.asarray(kd_weights, jnp.float32).reshape(-1)
    i2 = jnp.asarray(i_idx, jnp.int32).reshape(1, -1)       # lane-dense indices
    j2 = jnp.asarray(j_idx, jnp.int32).reshape(1, -1)
    N = i2.shape[1]

    if N % tile_n == 0:
        # Gridded over the pair axis; "parallel" shards it across v7x's 2 TCs.
        out = pl.pallas_call(
            _kd_ratio_batched_kernel,
            out_shape=jax.ShapeDtypeStruct((1, N), jnp.float32),
            grid=(N // tile_n,),
            in_specs=[
                pl.BlockSpec(memory_space=pltpu.MemorySpace.SMEM),       # weights
                pl.BlockSpec((1, tile_n), lambda n: (0, n)),             # i
                pl.BlockSpec((1, tile_n), lambda n: (0, n)),             # j
            ],
            out_specs=pl.BlockSpec((1, tile_n), lambda n: (0, n)),
            compiler_params=pltpu.CompilerParams(
                dimension_semantics=("parallel",)),
        )(w, i2, j2)
    else:
        out = pl.pallas_call(
            _kd_ratio_batched_kernel,
            out_shape=jax.ShapeDtypeStruct((1, N), jnp.float32),
            in_specs=[
                pl.BlockSpec(memory_space=pltpu.MemorySpace.SMEM),
                pl.BlockSpec(memory_space=pltpu.MemorySpace.VMEM),
                pl.BlockSpec(memory_space=pltpu.MemorySpace.VMEM),
            ],
            out_specs=pl.BlockSpec(memory_space=pltpu.MemorySpace.VMEM),
        )(w, i2, j2)
    return out.reshape(-1)


# ----------------------------------------------------------------------------
# Pure-JAX reference (mirrors the PyTorch forward)
# ----------------------------------------------------------------------------
def kd_weights_forward_ref(kd_weights, i, j):
    p = jax.nn.softmax(jnp.asarray(kd_weights, jnp.float32))
    return p[i] / p[j]


# ----------------------------------------------------------------------------
if __name__ == "__main__":
    K = 8                                   # one KD weight per distillation term
    kd_weights = jax.random.uniform(jax.random.PRNGKey(0), (K,), dtype=jnp.float32)

    # 1) single pair, static indices (closed over; no index DMA at all)
    out = jax.block_until_ready(kd_weights_forward(kd_weights, 2, 5))
    ref = kd_weights_forward_ref(kd_weights, 2, 5)
    assert out.shape == (), out.shape
    assert jnp.allclose(out, ref, rtol=1e-5, atol=1e-6), (float(out), float(ref))

    # 2) single pair, traced indices (SMEM scalar-gather path)
    i_t = jnp.asarray(0, jnp.int32)
    j_t = jnp.asarray(K - 1, jnp.int32)
    out2 = jax.block_until_ready(kd_weights_forward(kd_weights, i_t, j_t))
    ref2 = kd_weights_forward_ref(kd_weights, 0, K - 1)
    assert jnp.allclose(out2, ref2, rtol=1e-5, atol=1e-6), (float(out2), float(ref2))

    # 3) batched pairs: lane-dense (1, N) output, parallel grid over N
    N = 256
    ki, kj = jax.random.split(jax.random.PRNGKey(1))
    i_idx = jax.random.randint(ki, (N,), 0, K)
    j_idx = jax.random.randint(kj, (N,), 0, K)
    out3 = jax.block_until_ready(kd_weights_forward_batched(kd_weights, i_idx, j_idx))
    p = jax.nn.softmax(kd_weights)
    ref3 = p[i_idx] / p[j_idx]
    assert out3.shape == (N,), out3.shape
    assert jnp.allclose(out3, ref3, rtol=1e-5, atol=1e-6)

    print("KERNEL_OK")
</pallas_src>

<mosaic_0001>
module attributes {stable_mosaic.version = 11 : i64} {
  func.func @_kd_ratio_static_kernel(%arg0: memref<8xf32, #tpu.memory_space<smem>>, %arg1: memref<1x1xf32, #tpu.memory_space<vmem>>) attributes {dimension_semantics = [], scalar_prefetch = 0 : i64, scratch_operands = 0 : i64, tpu.core_type = #tpu.core_type<tc>} {
    %c2 = arith.constant 2 : index
    %0 = memref.load %arg0[%c2] : memref<8xf32, #tpu.memory_space<smem>>
    %c5 = arith.constant 5 : index
    %1 = memref.load %arg0[%c5] : memref<8xf32, #tpu.memory_space<smem>>
    %2 = arith.subf %0, %1 : f32
    %3 = vector.broadcast %2 : f32 to vector<1x1xf32>
    %4 = math.exp %3 : vector<1x1xf32>
    %c0 = arith.constant 0 : index
    %c0_0 = arith.constant 0 : index
    %5 = vector.load %arg1[%c0, %c0_0] : memref<1x1xf32, #tpu.memory_space<vmem>>, vector<1x1xf32>
    tpu.vector_store %arg1[%c0, %c0_0], %4 {strides = array<i32>} : memref<1x1xf32, #tpu.memory_space<vmem>>, vector<1x1xf32>,
    return
  }
}

</mosaic_0001>

<bundles_post_ra>
// kernel: tpu_custom_call.1
= control target key start
LH: loop header
LB: loop body
LE: loop exit
PB: predicated region body
PF: predicated region fallthrough
CT: control target
= control target key end

     0   :  { %6 = vsyncpa [#allocation4], 0  ;;  %s111_s0 = inlined_call_operand.hbm [shape: f32[8], index: 0, kind: input, shape index: {}]   ;;  %s112_s1 = inlined_call_operand.hbm [shape: f32[1,1], index: 1, kind: output, shape index: {}]  }
   0x1   :  { %7 = vsyncpa [#allocation3], 0  ;;  %s13_s8 = sshll.u32 %s111_s0, 4  ;;  %s93_s9 = smov [#allocation2]   ;;  %s14_s8 = int_to_ptr.hbm [resolvable:$true] %s13_s8 }
   0x2   :  { %16 = dma.hbm_to_smem %s14_s8, 16, %s93_s9, [#allocation4]  }
   0x3   :  { %89 = dma.done.wait [#allocation4], 16  }
   0x4   :  { %90 = vsyncadd [#allocation4], 4294967280 }
   0x5   :  { %21 = sfence }
   0x6   :  { %s47_s10 = sld [smem:[#allocation2 + $0x2]]  ;;  %s94_s13 = smov [#allocation5]   ;;  %vm28_vm0 = vcmask 0  }
   0x7   :  { %s48_s11 = sld [smem:[#allocation2 + $0x5]]  ;;  %s35_s14 = sshll.u32 %s94_s13, 4  ;;  %s36_s14 = int_to_ptr.vmem [resolvable:$true] %s35_s14 }
   0x8   :  { %s37_s17 = sshll.u32 %s112_s1, 4  ;;  %s38_s17 = int_to_ptr.hbm [resolvable:$true] %s37_s17 }
   0xd   :  { %s24_s12 = ssub.f32 %s47_s10, %s48_s11 }
   0xf   :  { %v25_v0 = vstv %s24_s12 }
  0x10   :  { %v26_v1 = vmul.f32 1.442695, %v25_v0 }
  0x12   :  { %51 = vpow2.f32 %v26_v1 }
  0x18   :  { %v52_v2 = vpop.eup %51 }
  0x19   :  { %29 = vst.msk [vmem:[#allocation5] sm:$0x1] %vm28_vm0, %v52_v2 }
  0x1a   :  { %40 = dma.vmem_to_hbm [thread:$0]  %s36_s14, 16, %s38_s17, [#allocation3]  }
  0x1b   :  { %91 = dma.done.wait [#allocation3], 16  }
  0x1c   :  { %92 = vsyncadd [#allocation3], 4294967280 }
  0x1d   :  { %45 = vsyncpa [#allocation3], 1 }
  0x1e   :  { %46 = vsyncpa [#allocation4], 1 }

</bundles_post_ra>
